<compile_context>
chip_gen: v5e
topology: v5e:2x2
jax: 0.10.0
libtpu: 0.0.40
codegen_flags: <defaults>
</compile_context>

<pallas_src>
import jax
import jax.numpy as jnp
from jax.experimental import pallas as pl
from jax.experimental.pallas import tpu as pltpu


def _round_up(n, m):
    return ((n + m - 1) // m) * m


def _dqn_kernel(x_ref, w1_ref, b1_ref, w2_ref, b2_ref, w3_ref, b3_ref, o_ref):
    # layer1: Linear(384, 256) + ReLU   (bf16 operands, f32 accumulate)
    h1 = jnp.dot(x_ref[...], w1_ref[...], preferred_element_type=jnp.float32)
    h1 = jnp.maximum(h1 + b1_ref[...], 0.0)
    # layer2: Linear(256, 256) + ReLU   (cast activation back to bf16 for the MXU)
    h2 = jnp.dot(h1.astype(jnp.bfloat16), w2_ref[...],
                 preferred_element_type=jnp.float32)
    h2 = jnp.maximum(h2 + b2_ref[...], 0.0)
    # layer3: Linear(256, n_actions), no activation
    out = jnp.dot(h2.astype(jnp.bfloat16), w3_ref[...],
                  preferred_element_type=jnp.float32)
    o_ref[...] = (out + b3_ref[...]).astype(o_ref.dtype)


def dqn_forward(x, params, *, batch_tile=256):
    """Fused DQN forward.

    x: (B, 384) float array. Returns (B, n_actions) float32 Q-values.
    Weights are bf16 (in, out); biases are f32 (1, out).
    """
    w1, b1, w2, b2, w3, b3 = params
    B, f_in = x.shape
    n_actions = w3.shape[1]

    # Batch tile: large batches stream in tiles of `batch_tile`; small batches use a
    # single tile rounded up to the sublane multiple of 8.
    tb = min(batch_tile, _round_up(B, 8))
    b_pad = _round_up(B, tb)
    if b_pad != B:
        x = jnp.pad(x, ((0, b_pad - B), (0, 0)))
    x = x.astype(jnp.bfloat16)

    grid = (b_pad // tb,)

    # Weights/biases: constant block index -> stay VMEM-resident across grid steps
    # (DMA'd once, not re-fetched per batch tile).
    const = lambda a: pl.BlockSpec(a.shape, lambda i: tuple(0 for _ in a.shape))

    out = pl.pallas_call(
        _dqn_kernel,
        out_shape=jax.ShapeDtypeStruct((b_pad, n_actions), jnp.float32),
        grid=grid,
        in_specs=[
            pl.BlockSpec((tb, f_in), lambda i: (i, 0)),   # x: streamed per batch tile
            const(w1), const(b1),
            const(w2), const(b2),
            const(w3), const(b3),
        ],
        out_specs=pl.BlockSpec((tb, n_actions), lambda i: (i, 0)),
        compiler_params=pltpu.CompilerParams(
            dimension_semantics=("parallel",),   # shard batch tiles across TCs (v7x)
        ),
    )(x, w1, b1, w2, b2, w3, b3)

    return out[:B] if b_pad != B else out


def init_dqn_params(key, n_actions, in_features=384, hidden=256):
    """Deterministic synthetic parameters, PyTorch-Linear-style uniform init.

    Weights stored transposed as (in, out) in bf16; biases in f32 as (1, out).
    """
    ks = jax.random.split(key, 6)

    def linear(kw, kb, fan_in, fan_out):
        bound = 1.0 / jnp.sqrt(jnp.float32(fan_in))
        w = jax.random.uniform(kw, (fan_in, fan_out), jnp.float32, -bound, bound)
        b = jax.random.uniform(kb, (1, fan_out), jnp.float32, -bound, bound)
        return w.astype(jnp.bfloat16), b

    w1, b1 = linear(ks[0], ks[1], in_features, hidden)
    w2, b2 = linear(ks[2], ks[3], hidden, hidden)
    w3, b3 = linear(ks[4], ks[5], hidden, n_actions)
    return (w1, b1, w2, b2, w3, b3)


def dqn_reference(x, params):
    """Pure-JAX reference mirroring the kernel's bf16-operand / f32-accumulate math."""
    w1, b1, w2, b2, w3, b3 = params
    h = jnp.dot(x.astype(jnp.bfloat16), w1, preferred_element_type=jnp.float32) + b1
    h = jnp.maximum(h, 0.0)
    h = jnp.dot(h.astype(jnp.bfloat16), w2, preferred_element_type=jnp.float32) + b2
    h = jnp.maximum(h, 0.0)
    return jnp.dot(h.astype(jnp.bfloat16), w3, preferred_element_type=jnp.float32) + b3


if __name__ == "__main__":
    key = jax.random.PRNGKey(0)
    k_params, k_x = jax.random.split(key)

    n_actions = 6   # len(env.action_space) — synthetic choice, env not available
    batch = 8
    in_features = 384

    params = init_dqn_params(k_params, n_actions, in_features=in_features)
    x = jax.random.normal(k_x, (batch, in_features), jnp.float32)

    out = dqn_forward(x, params)
    out = jax.block_until_ready(out)

    ref = dqn_reference(x, params)
    assert out.shape == (batch, n_actions), out.shape
    assert jnp.allclose(out, ref, atol=1e-2, rtol=1e-2), "mismatch vs reference"

    print("KERNEL_OK")
</pallas_src>

<mosaic_0001>
module attributes {stable_mosaic.version = 11 : i64} {
  func.func @_dqn_kernel(%arg0: i32, %arg1: memref<8x384xbf16, #tpu.memory_space<vmem>>, %arg2: memref<384x256xbf16, #tpu.memory_space<vmem>>, %arg3: memref<1x256xf32, #tpu.memory_space<vmem>>, %arg4: memref<256x256xbf16, #tpu.memory_space<vmem>>, %arg5: memref<1x256xf32, #tpu.memory_space<vmem>>, %arg6: memref<256x6xbf16, #tpu.memory_space<vmem>>, %arg7: memref<1x6xf32, #tpu.memory_space<vmem>>, %arg8: memref<8x6xf32, #tpu.memory_space<vmem>>) attributes {dimension_semantics = [#tpu.dimension_semantics<parallel>], iteration_bounds = array<i64: 1>, scalar_prefetch = 0 : i64, scratch_operands = 0 : i64, tpu.core_type = #tpu.core_type<tc>, window_params = [{transform_indices = @transform_0, window_bounds = array<i64: 8, 384>}, {pipeline_mode = #tpu.pipeline_mode<synchronous>, transform_indices = @transform_1, window_bounds = array<i64: 384, 256>}, {pipeline_mode = #tpu.pipeline_mode<synchronous>, transform_indices = @transform_2, window_bounds = array<i64: 1, 256>}, {pipeline_mode = #tpu.pipeline_mode<synchronous>, transform_indices = @transform_3, window_bounds = array<i64: 256, 256>}, {pipeline_mode = #tpu.pipeline_mode<synchronous>, transform_indices = @transform_4, window_bounds = array<i64: 1, 256>}, {pipeline_mode = #tpu.pipeline_mode<synchronous>, transform_indices = @transform_5, window_bounds = array<i64: 256, 6>}, {pipeline_mode = #tpu.pipeline_mode<synchronous>, transform_indices = @transform_6, window_bounds = array<i64: 1, 6>}, {transform_indices = @transform_7, window_bounds = array<i64: 8, 6>}]} {
    %c0 = arith.constant 0 : index
    %c0_0 = arith.constant 0 : index
    %0 = vector.load %arg1[%c0, %c0_0] : memref<8x384xbf16, #tpu.memory_space<vmem>>, vector<8x384xbf16>
    %c0_1 = arith.constant 0 : index
    %c0_2 = arith.constant 0 : index
    %1 = vector.load %arg2[%c0_1, %c0_2] : memref<384x256xbf16, #tpu.memory_space<vmem>>, vector<384x256xbf16>
    %cst = arith.constant dense<0.000000e+00> : vector<8x256xf32>
    %2 = tpu.matmul %0, %1, %cst {dimension_numbers = #tpu.dot_dimension_numbers<[1], [0], [0], [1], [0, 0, 1, 1], [], []>} : vector<8x384xbf16>, vector<384x256xbf16>, vector<8x256xf32> -> vector<8x256xf32>
    %c0_3 = arith.constant 0 : index
    %c0_4 = arith.constant 0 : index
    %3 = vector.load %arg3[%c0_3, %c0_4] : memref<1x256xf32, #tpu.memory_space<vmem>>, vector<1x256xf32>
    %4 = vector.broadcast %3 : vector<1x256xf32> to vector<8x256xf32>
    %5 = arith.addf %2, %4 : vector<8x256xf32>
    %cst_5 = arith.constant 0.000000e+00 : f32
    %6 = vector.broadcast %cst_5 : f32 to vector<8x256xf32>
    %7 = arith.maximumf %5, %6 : vector<8x256xf32>
    %8 = arith.truncf %7 : vector<8x256xf32> to vector<8x256xbf16>
    %c0_6 = arith.constant 0 : index
    %c0_7 = arith.constant 0 : index
    %9 = vector.load %arg4[%c0_6, %c0_7] : memref<256x256xbf16, #tpu.memory_space<vmem>>, vector<256x256xbf16>
    %cst_8 = arith.constant dense<0.000000e+00> : vector<8x256xf32>
    %10 = tpu.matmul %8, %9, %cst_8 {dimension_numbers = #tpu.dot_dimension_numbers<[1], [0], [0], [1], [0, 0, 1, 1], [], []>} : vector<8x256xbf16>, vector<256x256xbf16>, vector<8x256xf32> -> vector<8x256xf32>
    %c0_9 = arith.constant 0 : index
    %c0_10 = arith.constant 0 : index
    %11 = vector.load %arg5[%c0_9, %c0_10] : memref<1x256xf32, #tpu.memory_space<vmem>>, vector<1x256xf32>
    %12 = vector.broadcast %11 : vector<1x256xf32> to vector<8x256xf32>
    %13 = arith.addf %10, %12 : vector<8x256xf32>
    %cst_11 = arith.constant 0.000000e+00 : f32
    %14 = vector.broadcast %cst_11 : f32 to vector<8x256xf32>
    %15 = arith.maximumf %13, %14 : vector<8x256xf32>
    %16 = arith.truncf %15 : vector<8x256xf32> to vector<8x256xbf16>
    %c0_12 = arith.constant 0 : index
    %c0_13 = arith.constant 0 : index
    %17 = vector.load %arg6[%c0_12, %c0_13] : memref<256x6xbf16, #tpu.memory_space<vmem>>, vector<256x6xbf16>
    %cst_14 = arith.constant dense<0.000000e+00> : vector<8x6xf32>
    %18 = tpu.matmul %16, %17, %cst_14 {dimension_numbers = #tpu.dot_dimension_numbers<[1], [0], [0], [1], [0, 0, 1, 1], [], []>} : vector<8x256xbf16>, vector<256x6xbf16>, vector<8x6xf32> -> vector<8x6xf32>
    %c0_15 = arith.constant 0 : index
    %c0_16 = arith.constant 0 : index
    %19 = vector.load %arg7[%c0_15, %c0_16] : memref<1x6xf32, #tpu.memory_space<vmem>>, vector<1x6xf32>
    %20 = vector.broadcast %19 : vector<1x6xf32> to vector<8x6xf32>
    %21 = arith.addf %18, %20 : vector<8x6xf32>
    %c0_17 = arith.constant 0 : index
    %c0_18 = arith.constant 0 : index
    %22 = vector.load %arg8[%c0_17, %c0_18] : memref<8x6xf32, #tpu.memory_space<vmem>>, vector<8x6xf32>
    tpu.vector_store %arg8[%c0_17, %c0_18], %21 {strides = array<i32>} : memref<8x6xf32, #tpu.memory_space<vmem>>, vector<8x6xf32>,
    return
  }
  func.func @transform_0(%arg0: i32) -> (i32, i32) {
    %c0_i32 = arith.constant 0 : i32
    %c0_i32_0 = arith.constant 0 : i32
    return %arg0, %c0_i32 : i32, i32
  }
  func.func @transform_1(%arg0: i32) -> (i32, i32) {
    %c0_i32 = arith.constant 0 : i32
    %c0_i32_0 = arith.constant 0 : i32
    %c0_i32_1 = arith.constant 0 : i32
    return %c0_i32, %c0_i32_0 : i32, i32
  }
  func.func @transform_2(%arg0: i32) -> (i32, i32) {
    %c0_i32 = arith.constant 0 : i32
    %c0_i32_0 = arith.constant 0 : i32
    %c0_i32_1 = arith.constant 0 : i32
    return %c0_i32, %c0_i32_0 : i32, i32
  }
  func.func @transform_3(%arg0: i32) -> (i32, i32) {
    %c0_i32 = arith.constant 0 : i32
    %c0_i32_0 = arith.constant 0 : i32
    %c0_i32_1 = arith.constant 0 : i32
    return %c0_i32, %c0_i32_0 : i32, i32
  }
  func.func @transform_4(%arg0: i32) -> (i32, i32) {
    %c0_i32 = arith.constant 0 : i32
    %c0_i32_0 = arith.constant 0 : i32
    %c0_i32_1 = arith.constant 0 : i32
    return %c0_i32, %c0_i32_0 : i32, i32
  }
  func.func @transform_5(%arg0: i32) -> (i32, i32) {
    %c0_i32 = arith.constant 0 : i32
    %c0_i32_0 = arith.constant 0 : i32
    %c0_i32_1 = arith.constant 0 : i32
    return %c0_i32, %c0_i32_0 : i32, i32
  }
  func.func @transform_6(%arg0: i32) -> (i32, i32) {
    %c0_i32 = arith.constant 0 : i32
    %c0_i32_0 = arith.constant 0 : i32
    %c0_i32_1 = arith.constant 0 : i32
    return %c0_i32, %c0_i32_0 : i32, i32
  }
  func.func @transform_7(%arg0: i32) -> (i32, i32) {
    %c0_i32 = arith.constant 0 : i32
    %c0_i32_0 = arith.constant 0 : i32
    return %arg0, %c0_i32 : i32, i32
  }
}

</mosaic_0001>

<bundles_post_ra>
// kernel: tpu_custom_call.1
= control target key start
LH: loop header
LB: loop body
LE: loop exit
PB: predicated region body
PF: predicated region fallthrough
CT: control target
= control target key end

     0   :  { %12 = vsyncpa [#allocation3], 0  ;;  %s1569_s0 = inlined_call_operand.vmem [shape: bf16[8,384], index: 0, kind: input, shape index: {}]   ;;  %s1570_s1 = inlined_call_operand.hbm [shape: bf16[384,256], index: 1, kind: input, shape index: {}]   ;;  %s1571_s2 = inlined_call_operand.vmem [shape: f32[1,256], index: 2, kind: input, shape index: {}]   ;;  %s1572_s3 = inlined_call_operand.hbm [shape: bf16[256,256], index: 3, kind: input, shape index: {}]   ;;  %s1573_s4 = inlined_call_operand.vmem [shape: f32[1,256], index: 4, kind: input, shape index: {}]   ;;  %s1574_s5 = inlined_call_operand.vmem [shape: bf16[256,6], index: 5, kind: input, shape index: {}]   ;;  %s1575_s6 = inlined_call_operand.vmem [shape: f32[1,6], index: 6, kind: input, shape index: {}]   ;;  %s1576_s7 = inlined_call_operand.hbm [shape: f32[8,6], index: 7, kind: output, shape index: {}]  }
   0x1   :  { %13 = vsyncpa [#allocation6], 0 }
   0x2   :  { %14 = vsyncpa [#allocation4], 0  ;;  %s21_s26 = sshll.u32 %s1570_s1, 4  ;;  %s1444_s27 = smov [#allocation2]   ;;  %s22_s26 = int_to_ptr.hbm [resolvable:$true] %s21_s26 }
   0x3   :  { %s23_s28 = sshll.u32 %s1444_s27, 4  ;;  %s36_s8 = sshll.u32 %s1572_s3, 4  ;;  %s24_s28 = int_to_ptr.vmem [resolvable:$true] %s23_s28  ;;  %s37_s8 = int_to_ptr.hbm [resolvable:$true] %s36_s8 }
   0x4   :  { %s1445_s9 = smov 128   ;;  %s1446_s10 = smov 8  }
   0x5   :  { %29 = dma.hbm_to_vmem [thread:$0]  %s22_s26, 6144, %s24_s28, [#allocation3], %s1445_s9, %s1445_s9, %s1446_s10  }
   0x6   :  { %s1447_s11 = smov [#allocation5]  }
   0x7   :  { %s38_s12 = sshll.u32 %s1447_s11, 4  ;;  %s39_s12 = int_to_ptr.vmem [resolvable:$true] %s38_s12 }
   0x8   :  { %44 = dma.hbm_to_vmem [thread:$0]  %s37_s8, 4096, %s39_s12, [#allocation6], %s1445_s9, %s1445_s9, %s1446_s10  }
   0x9   :  { %1438 = dma.done.wait [#allocation3], 6144  }
   0xa   :  { %1439 = vsyncadd [#allocation3], 4294961152 }
   0xb   :  { %1440 = dma.done.wait [#allocation6], 4096  }
   0xc   :  { %1441 = vsyncadd [#allocation6], 4294963200  ;;  %v938_v0 = vld [vmem:[#allocation2 + $0x70] sm:$0xf]  ;;  %v1279_v1 = vld [vmem:[#allocation2 + $0x74] sm:$0xf0] }
   0xd   :  { %v1002_v2 = vld [vmem:[#allocation2 + $0xf0] sm:$0xf]  ;;  %v939_v3 = vor.u32 %v1279_v1, %v938_v0  ;;  %v1295_v4 = vld [vmem:[#allocation2 + $0xf4] sm:$0xf0]  ;;  %v930_v9 = vld [vmem:[#allocation2 + $0x60] sm:$0xf] }
   0xe   :  { %v1066_v5 = vld [vmem:[#allocation2 + $0x170] sm:$0xf]  ;;  %v1311_v6 = vld [vmem:[#allocation2 + $0x174] sm:$0xf0]  ;;  %v1003_v7 = vor.u32 %v1295_v4, %v1002_v2  ;;  %v1277_v10 = vld [vmem:[#allocation2 + $0x64] sm:$0xf0] }
   0xf   :  { %v1067_v8 = vor.u32 %v1311_v6, %v1066_v5  ;;  %v994_v11 = vld [vmem:[#allocation2 + $0xe0] sm:$0xf]  ;;  %366 = vmatpush.bf16.msra.mxu0 %v939_v3  ;;  %v931_v12 = vor.u32 %v1277_v10, %v930_v9  ;;  %v1293_v13 = vld [vmem:[#allocation2 + $0xe4] sm:$0xf0]  ;;  %v922_v18 = vld [vmem:[#allocation2 + $0x50] sm:$0xf] }
  0x10   :  { %v1058_v14 = vld [vmem:[#allocation2 + $0x160] sm:$0xf]  ;;  %v1309_v15 = vld [vmem:[#allocation2 + $0x164] sm:$0xf0]  ;;  %379 = vmatpush.bf16.msra.mxu1 %v1003_v7  ;;  %v995_v16 = vor.u32 %v1293_v13, %v994_v11  ;;  %v1275_v19 = vld [vmem:[#allocation2 + $0x54] sm:$0xf0] }
  0x11   :  { %392 = vmatpush.bf16.msra.mxu2 %v1067_v8  ;;  %v1059_v17 = vor.u32 %v1309_v15, %v1058_v14  ;;  %v986_v20 = vld [vmem:[#allocation2 + $0xd0] sm:$0xf]  ;;  %v1291_v21 = vld [vmem:[#allocation2 + $0xd4] sm:$0xf0]  ;;  %v923_v24 = vor.u32 %v1275_v19, %v922_v18  ;;  %v1278_v25 = vld [vmem:[#allocation2 + $0x74] sm:$0xf] }
  0x12   :  { %v1050_v22 = vld [vmem:[#allocation2 + $0x150] sm:$0xf]  ;;  %v1307_v23 = vld [vmem:[#allocation2 + $0x154] sm:$0xf0]  ;;  %v940_v26 = vld [vmem:[#allocation2 + $0x78] sm:$0xf0]  ;;  %v987_v27 = vor.u32 %v1291_v21, %v986_v20 }
  0x13   :  { %367 = vmatpush.bf16.msra.mxu0 %v931_v12  ;;  %v1051_v28 = vor.u32 %v1307_v23, %v1050_v22  ;;  %v914_v29 = vld [vmem:[#allocation2 + $0x40] sm:$0xf]  ;;  %v1273_v30 = vld [vmem:[#allocation2 + $0x44] sm:$0xf0]  ;;  %v943_v32 = vor.u32 %v1278_v25, %v940_v26  ;;  %v1276_v36 = vld [vmem:[#allocation2 + $0x64] sm:$0xf] }
  0x14   :  { %380 = vmatpush.bf16.msra.mxu1 %v995_v16  ;;  %v978_v31 = vld [vmem:[#allocation2 + $0xc0] sm:$0xf]  ;;  %v1289_v33 = vld [vmem:[#allocation2 + $0xc4] sm:$0xf0]  ;;  %v932_v37 = vld [vmem:[#allocation2 + $0x68] sm:$0xf0]  ;;  %v915_v38 = vor.u32 %v1273_v30, %v914_v29 }
  0x15   :  { %393 = vmatpush.bf16.msra.mxu2 %v1059_v17  ;;  %v1042_v34 = vld [vmem:[#allocation2 + $0x140] sm:$0xf]  ;;  %v1305_v35 = vld [vmem:[#allocation2 + $0x144] sm:$0xf0]  ;;  %405 = vmatpush.bf16.msra.mxu3 %v943_v32  ;;  %v906_v39 = vld [vmem:[#allocation2 + $0x30] sm:$0xf]  ;;  %v935_v41 = vor.u32 %v1276_v36, %v932_v37  ;;  %v979_v42 = vor.u32 %v1289_v33, %v978_v31 }
  0x16   :  { %v1271_v40 = vld [vmem:[#allocation2 + $0x34] sm:$0xf0]  ;;  %v1043_v43 = vor.u32 %v1305_v35, %v1042_v34  ;;  %v970_v44 = vld [vmem:[#allocation2 + $0xb0] sm:$0xf]  ;;  %v1274_v46 = vld [vmem:[#allocation2 + $0x54] sm:$0xf] }
  0x17   :  { %368 = vmatpush.bf16.msra.mxu0 %v923_v24  ;;  %v1287_v45 = vld [vmem:[#allocation2 + $0xb4] sm:$0xf0]  ;;  %v1034_v47 = vld [vmem:[#allocation2 + $0x130] sm:$0xf]  ;;  %v924_v49 = vld [vmem:[#allocation2 + $0x58] sm:$0xf0]  ;;  %v907_v51 = vor.u32 %v1271_v40, %v906_v39 }
  0x18   :  { %381 = vmatpush.bf16.msra.mxu1 %v987_v27  ;;  %v1303_v48 = vld [vmem:[#allocation2 + $0x134] sm:$0xf0]  ;;  %v927_v50 = vor.u32 %v1274_v46, %v924_v49  ;;  %v1272_v52 = vld [vmem:[#allocation2 + $0x44] sm:$0xf]  ;;  %v916_v53 = vld [vmem:[#allocation2 + $0x48] sm:$0xf0]  ;;  %v971_v54 = vor.u32 %v1287_v45, %v970_v44 }
  0x19   :  { %394 = vmatpush.bf16.msra.mxu2 %v1051_v28  ;;  %406 = vmatpush.bf16.msra.mxu3 %v935_v41  ;;  %v1035_v55 = vor.u32 %v1303_v48, %v1034_v47  ;;  %v898_v56 = vld [vmem:[#allocation2 + $0x20] sm:$0xf]  ;;  %v1269_v57 = vld [vmem:[#allocation2 + $0x24] sm:$0xf0]  ;;  %v919_v62 = vor.u32 %v1272_v52, %v916_v53  ;;  %v1270_v0 = vld [vmem:[#allocation2 + $0x34] sm:$0xf] }
  0x1a   :  { %v962_v58 = vld [vmem:[#allocation2 + $0xa0] sm:$0xf]  ;;  %v1285_v59 = vld [vmem:[#allocation2 + $0xa4] sm:$0xf0]  ;;  %v899_v63 = vor.u32 %v1269_v57, %v898_v56  ;;  %v908_v1 = vld [vmem:[#allocation2 + $0x38] sm:$0xf0] }
  0x1b   :  { %369 = vmatpush.bf16.msra.mxu0 %v915_v38  ;;  %v1026_v60 = vld [vmem:[#allocation2 + $0x120] sm:$0xf]  ;;  %v1301_v61 = vld [vmem:[#allocation2 + $0x124] sm:$0xf0]  ;;  %v963_v2 = vor.u32 %v1285_v59, %v962_v58  ;;  %v890_v4 = vld [vmem:[#allocation2 + $0x10] sm:$0xf]  ;;  %v911_v12 = vor.u32 %v1270_v0, %v908_v1 }
  0x1c   :  { %382 = vmatpush.bf16.msra.mxu1 %v979_v42  ;;  %v1027_v3 = vor.u32 %v1301_v61, %v1026_v60  ;;  %v1267_v5 = vld [vmem:[#allocation2 + $0x14] sm:$0xf0]  ;;  %v954_v6 = vld [vmem:[#allocation2 + $0x90] sm:$0xf]  ;;  %v882_v10 = vld [vmem:[#allocation2] sm:$0xf] }
  0x1d   :  { %395 = vmatpush.bf16.msra.mxu2 %v1043_v43  ;;  %407 = vmatpush.bf16.msra.mxu3 %v927_v50  ;;  %v1283_v7 = vld [vmem:[#allocation2 + $0x94] sm:$0xf0]  ;;  %v1018_v8 = vld [vmem:[#allocation2 + $0x110] sm:$0xf]  ;;  %v1265_v11 = vld [vmem:[#allocation2 + $0x4] sm:$0xf0]  ;;  %v891_v13 = vor.u32 %v1267_v5, %v890_v4 }
  0x1e   :  { %v1299_v9 = vld [vmem:[#allocation2 + $0x114] sm:$0xf0]  ;;  %v1268_v14 = vld [vmem:[#allocation2 + $0x24] sm:$0xf]  ;;  %v900_v15 = vld [vmem:[#allocation2 + $0x28] sm:$0xf0]  ;;  %v955_v17 = vor.u32 %v1283_v7, %v954_v6  ;;  %v883_v30 = vor.u32 %v1265_v11, %v882_v10 }
  0x1f   :  { %370 = vmatpush.bf16.msra.mxu0 %v907_v51  ;;  %v59_v16 = vld [vmem:[%s1569_s0] sm:$0xff]  ;;  %v1019_v18 = vor.u32 %v1299_v9, %v1018_v8  ;;  %v1281_v20 = vld [vmem:[#allocation2 + $0x84] sm:$0xf0]  ;;  %v1294_v21 = vld [vmem:[#allocation2 + $0xf4] sm:$0xf]  ;;  %v903_v28 = vor.u32 %v1268_v14, %v900_v15  ;;  %s869_s26 = sshll.u32 %s1576_s7, 4  ;;  %s870_s26 = int_to_ptr.hbm [resolvable:$true] %s869_s26 }
  0x20   :  { %383 = vmatpush.bf16.msra.mxu1 %v971_v54  ;;  %v946_v19 = vld [vmem:[#allocation2 + $0x80] sm:$0xf]  ;;  %v1004_v22 = vld [vmem:[#allocation2 + $0xf8] sm:$0xf0]  ;;  %v1310_v23 = vld [vmem:[#allocation2 + $0x174] sm:$0xf]  ;;  %v117_v29 = vunpack.c.l.b16 %v59_v16  ;;  %v118_v33 = vunpack.c.h.b16 %v59_v16 }
  0x21   :  { %396 = vmatpush.bf16.msra.mxu2 %v1035_v55  ;;  %408 = vmatpush.bf16.msra.mxu3 %v919_v62  ;;  %v60_v24 = vld [vmem:[%s1569_s0 + $0x8] sm:$0xf]  ;;  %v1068_v25 = vld [vmem:[#allocation2 + $0x178] sm:$0xf0]  ;;  %v1010_v26 = vld [vmem:[#allocation2 + $0x100] sm:$0xf]  ;;  %v947_v34 = vor.u32 %v1281_v20, %v946_v19  ;;  %v1007_v35 = vor.u32 %v1294_v21, %v1004_v22 }
  0x22   :  { %v1297_v27 = vld [vmem:[#allocation2 + $0x104] sm:$0xf0]  ;;  %v1266_v31 = vld [vmem:[#allocation2 + $0x14] sm:$0xf]  ;;  %v892_v32 = vld [vmem:[#allocation2 + $0x18] sm:$0xf0]  ;;  %v119_v36 = vunpack.c.l.b16 %v60_v24  ;;  %v1071_v37 = vor.u32 %v1310_v23, %v1068_v25  ;;  %v120_v43 = vpack.c.b16 %v117_v29, %v117_v29  ;;  %v1501_v45 = vpack.c.b16 %v118_v33, %v118_v33 }
  0x23   :  { %371 = vmatpush.bf16.msra.mxu0 %v899_v63  ;;  %v1011_v38 = vor.u32 %v1297_v27, %v1010_v26  ;;  %v1292_v39 = vld [vmem:[#allocation2 + $0xe4] sm:$0xf]  ;;  %v996_v40 = vld [vmem:[#allocation2 + $0xe8] sm:$0xf0]  ;;  %v895_v44 = vor.u32 %v1266_v31, %v892_v32  ;;  %v1130_v50 = vld [vmem:[#allocation5 + $0x70] sm:$0xf] }
  0x24   :  { %384 = vmatpush.bf16.msra.mxu1 %v963_v2  ;;  %v1308_v41 = vld [vmem:[#allocation2 + $0x164] sm:$0xf]  ;;  %v1060_v42 = vld [vmem:[#allocation2 + $0x168] sm:$0xf0]  ;;  %v999_v48 = vor.u32 %v1292_v39, %v996_v40  ;;  %v1503_v49 = vpack.c.b16 %v119_v36, %v119_v36  ;;  %v1290_v52 = vld [vmem:[#allocation2 + $0xd4] sm:$0xf] }
  0x25   :  { %397 = vmatpush.bf16.msra.mxu2 %v1027_v3  ;;  %409 = vmatpush.bf16.msra.mxu3 %v911_v12  ;;  %v1264_v46 = vld [vmem:[#allocation2 + $0x4] sm:$0xf]  ;;  %v884_v47 = vld [vmem:[#allocation2 + $0x8] sm:$0xf0]  ;;  %v1063_v51 = vor.u32 %v1308_v41, %v1060_v42  ;;  %v988_v53 = vld [vmem:[#allocation2 + $0xd8] sm:$0xf0] }
  0x26   :  { %v1327_v54 = vld [vmem:[#allocation5 + $0x74] sm:$0xf0]  ;;  %v1306_v55 = vld [vmem:[#allocation2 + $0x154] sm:$0xf]  ;;  %v1052_v56 = vld [vmem:[#allocation2 + $0x158] sm:$0xf0]  ;;  %v887_v57 = vor.u32 %v1264_v46, %v884_v47  ;;  %v991_v61 = vor.u32 %v1290_v52, %v988_v53 }
  0x27   :  { %372 = vmatpush.bf16.msra.mxu0 %v891_v13  ;;  %v1131_v58 = vor.u32 %v1327_v54, %v1130_v50  ;;  %v1122_v59 = vld [vmem:[#allocation5 + $0x60] sm:$0xf]  ;;  %v1325_v60 = vld [vmem:[#allocation5 + $0x64] sm:$0xf0]  ;;  %v1055_v62 = vor.u32 %v1306_v55, %v1052_v56  ;;  %v1288_v63 = vld [vmem:[#allocation2 + $0xc4] sm:$0xf] }
  0x28   :  { %385 = vmatpush.bf16.msra.mxu1 %v955_v17  ;;  %v980_v0 = vld [vmem:[#allocation2 + $0xc8] sm:$0xf0]  ;;  %v1304_v1 = vld [vmem:[#allocation2 + $0x144] sm:$0xf]  ;;  %v1123_v3 = vor.u32 %v1325_v60, %v1122_v59  ;;  %v1114_v4 = vld [vmem:[#allocation5 + $0x50] sm:$0xf] }
  0x29   :  { %398 = vmatpush.bf16.msra.mxu2 %v1019_v18  ;;  %410 = vmatpush.bf16.msra.mxu3 %v903_v28  ;;  %v1044_v2 = vld [vmem:[#allocation2 + $0x148] sm:$0xf0]  ;;  %v1323_v5 = vld [vmem:[#allocation5 + $0x54] sm:$0xf0]  ;;  %v983_v6 = vor.u32 %v1288_v63, %v980_v0  ;;  %v1286_v8 = vld [vmem:[#allocation2 + $0xb4] sm:$0xf] }
  0x2a   :  { %v1047_v7 = vor.u32 %v1304_v1, %v1044_v2  ;;  %v972_v9 = vld [vmem:[#allocation2 + $0xb8] sm:$0xf0]  ;;  %v1302_v10 = vld [vmem:[#allocation2 + $0x134] sm:$0xf]  ;;  %v1115_v12 = vor.u32 %v1323_v5, %v1114_v4  ;;  %v1106_v13 = vld [vmem:[#allocation5 + $0x40] sm:$0xf] }
  0x2b   :  { %373 = vmatpush.bf16.msra.mxu0 %v883_v30  ;;  %v1036_v11 = vld [vmem:[#allocation2 + $0x138] sm:$0xf0]  ;;  %v1321_v14 = vld [vmem:[#allocation5 + $0x44] sm:$0xf0]  ;;  %v975_v15 = vor.u32 %v1286_v8, %v972_v9  ;;  %v1284_v17 = vld [vmem:[#allocation2 + $0xa4] sm:$0xf] }
  0x2c   :  { %386 = vmatpush.bf16.msra.mxu1 %v947_v34  ;;  %v1039_v16 = vor.u32 %v1302_v10, %v1036_v11  ;;  %v964_v18 = vld [vmem:[#allocation2 + $0xa8] sm:$0xf0]  ;;  %v1300_v19 = vld [vmem:[#allocation2 + $0x124] sm:$0xf]  ;;  %v1107_v21 = vor.u32 %v1321_v14, %v1106_v13  ;;  %v1098_v22 = vld [vmem:[#allocation5 + $0x30] sm:$0xf] }
  0x2d   :  { %399 = vmatpush.bf16.msra.mxu2 %v1011_v38  ;;  %411 = vmatpush.bf16.msra.mxu3 %v895_v44  ;;  %v1028_v20 = vld [vmem:[#allocation2 + $0x128] sm:$0xf0]  ;;  %v1319_v23 = vld [vmem:[#allocation5 + $0x34] sm:$0xf0]  ;;  %v967_v24 = vor.u32 %v1284_v17, %v964_v18  ;;  %v1282_v26 = vld [vmem:[#allocation2 + $0x94] sm:$0xf] }
  0x2e   :  { %374 = vmatmul.bf16.vlgmr.msra.gmra.mxu0 %v120_v43  ;;  %v1031_v25 = vor.u32 %v1300_v19, %v1028_v20  ;;  %v956_v27 = vld [vmem:[#allocation2 + $0x98] sm:$0xf0]  ;;  %v1298_v28 = vld [vmem:[#allocation2 + $0x114] sm:$0xf]  ;;  %v1099_v30 = vor.u32 %v1319_v23, %v1098_v22  ;;  %v1280_v33 = vld [vmem:[#allocation2 + $0x84] sm:$0xf] }
  0x2f   :  { %418 = vmatpush.bf16.msrb.mxu0 %v1007_v35  ;;  %387 = vmatmul.bf16.vlgmr.msra.gmra.mxu1 %v1501_v45  ;;  %v1020_v29 = vld [vmem:[#allocation2 + $0x118] sm:$0xf0]  ;;  %v959_v31 = vor.u32 %v1282_v26, %v956_v27  ;;  %v948_v34 = vld [vmem:[#allocation2 + $0x88] sm:$0xf0]  ;;  %v1296_v35 = vld [vmem:[#allocation2 + $0x104] sm:$0xf] }
  0x30   :  { %431 = vmatpush.bf16.msrb.mxu1 %v1071_v37  ;;  %400 = vmatmul.bf16.vlgmr.msra.gmra.mxu2 %v1503_v49  ;;  %v1023_v32 = vor.u32 %v1298_v28, %v1020_v29  ;;  %v1012_v36 = vld [vmem:[#allocation2 + $0x108] sm:$0xf0]  ;;  %v1326_v37 = vld [vmem:[#allocation5 + $0x74] sm:$0xf]  ;;  %v1132_v38 = vld [vmem:[#allocation5 + $0x78] sm:$0xf0]  ;;  %v951_v39 = vor.u32 %v1280_v33, %v948_v34 }
  0x31   :  { %646 = vmatpush.bf16.msrb.mxu2 %v1131_v58  ;;  %412 = vmatpush.bf16.msra.mxu3 %v887_v57  ;;  %v1015_v40 = vor.u32 %v1296_v35, %v1012_v36  ;;  %v1135_v41 = vor.u32 %v1326_v37, %v1132_v38  ;;  %v1324_v42 = vld [vmem:[#allocation5 + $0x64] sm:$0xf]  ;;  %v1322_v46 = vld [vmem:[#allocation5 + $0x54] sm:$0xf]  ;;  %v1116_v47 = vld [vmem:[#allocation5 + $0x58] sm:$0xf0] }
  0x32   :  { %v1320_v50 = vld [vmem:[#allocation5 + $0x44] sm:$0xf]  ;;  %v1318_v53 = vld [vmem:[#allocation5 + $0x34] sm:$0xf]  ;;  %v1100_v54 = vld [vmem:[#allocation5 + $0x38] sm:$0xf0] }
  0x33   :  { %419 = vmatpush.bf16.msrb.mxu0 %v999_v48  ;;  %v1119_v48 = vor.u32 %v1322_v46, %v1116_v47  ;;  %v1103_v55 = vor.u32 %v1318_v53, %v1100_v54  ;;  %v1090_v56 = vld [vmem:[#allocation5 + $0x20] sm:$0xf]  ;;  %v1317_v57 = vld [vmem:[#allocation5 + $0x24] sm:$0xf0]  ;;  %v1316_v58 = vld [vmem:[#allocation5 + $0x24] sm:$0xf] }
  0x34   :  { %432 = vmatpush.bf16.msrb.mxu1 %v1063_v51  ;;  %413 = vmatmul.bf16.vlgmr.msra.gmra.mxu3 %v120_v43  ;;  %v1124_v43 = vld [vmem:[#allocation5 + $0x68] sm:$0xf0]  ;;  %v1091_v59 = vor.u32 %v1317_v57, %v1090_v56  ;;  %v1196_v0 = vld [vmem:[#allocation5 + $0xf8] sm:$0xf0]  ;;  %v1082_v2 = vld [vmem:[#allocation5 + $0x10] sm:$0xf] }
  0x35   :  { %647 = vmatpush.bf16.msrb.mxu2 %v1123_v3  ;;  %v1127_v44 = vor.u32 %v1324_v42, %v1124_v43  ;;  %v1108_v51 = vld [vmem:[#allocation5 + $0x48] sm:$0xf0]  ;;  %v1315_v3 = vld [vmem:[#allocation5 + $0x14] sm:$0xf0]  ;;  %v1314_v4 = vld [vmem:[#allocation5 + $0x14] sm:$0xf] }
  0x36   :  { %v1111_v52 = vor.u32 %v1320_v50, %v1108_v51  ;;  %v1092_v60 = vld [vmem:[#allocation5 + $0x28] sm:$0xf0]  ;;  %v1083_v5 = vor.u32 %v1315_v3, %v1082_v2  ;;  %v1186_v8 = vld [vmem:[#allocation5 + $0xe0] sm:$0xf]  ;;  %v1341_v9 = vld [vmem:[#allocation5 + $0xe4] sm:$0xf0] }
  0x37   :  { %420 = vmatpush.bf16.msrb.mxu0 %v991_v61  ;;  %v1095_v61 = vor.u32 %v1316_v58, %v1092_v60  ;;  %v1340_v10 = vld [vmem:[#allocation5 + $0xe4] sm:$0xf]  ;;  %v1187_v11 = vor.u32 %v1341_v9, %v1186_v8  ;;  %v1074_v14 = vld [vmem:[#allocation5] sm:$0xf]  ;;  %v1076_v18 = vld [vmem:[#allocation5 + $0x8] sm:$0xf0] }
  0x38   :  { %433 = vmatpush.bf16.msrb.mxu1 %v1055_v62  ;;  %v1343_v62 = vld [vmem:[#allocation5 + $0xf4] sm:$0xf0]  ;;  %v1178_v20 = vld [vmem:[#allocation5 + $0xd0] sm:$0xf]  ;;  %v1338_v22 = vld [vmem:[#allocation5 + $0xd4] sm:$0xf] }
  0x39   :  { %648 = vmatpush.bf16.msrb.mxu2 %v1115_v12  ;;  %v1188_v12 = vld [vmem:[#allocation5 + $0xe8] sm:$0xf0]  ;;  %v1170_v26 = vld [vmem:[#allocation5 + $0xc0] sm:$0xf]  ;;  %v1337_v27 = vld [vmem:[#allocation5 + $0xc4] sm:$0xf0] }
  0x3a   :  { %v1191_v13 = vor.u32 %v1340_v10, %v1188_v12  ;;  %v1171_v28 = vor.u32 %v1337_v27, %v1170_v26  ;;  %v1336_v29 = vld [vmem:[#allocation5 + $0xc4] sm:$0xf]  ;;  %v1335_v33 = vld [vmem:[#allocation5 + $0xb4] sm:$0xf0]  ;;  %v1334_v34 = vld [vmem:[#allocation5 + $0xb4] sm:$0xf] }
  0x3b   :  { %421 = vmatpush.bf16.msrb.mxu0 %v983_v6  ;;  %v1084_v6 = vld [vmem:[#allocation5 + $0x18] sm:$0xf0]  ;;  %v1154_v38 = vld [vmem:[#allocation5 + $0xa0] sm:$0xf]  ;;  %v1146_v47 = vld [vmem:[#allocation5 + $0x90] sm:$0xf] }
  0x3c   :  { %434 = vmatpush.bf16.msrb.mxu1 %v1047_v7  ;;  %v1087_v7 = vor.u32 %v1314_v4, %v1084_v6  ;;  %v1164_v35 = vld [vmem:[#allocation5 + $0xb8] sm:$0xf0]  ;;  %v109_v43 = vld [vmem:[%s1571_s2] sm:$0x3]  ;;  %v1330_v50 = vld [vmem:[#allocation5 + $0x94] sm:$0xf] }
  0x3d   :  { %649 = vmatpush.bf16.msrb.mxu2 %v1107_v21  ;;  %v1339_v21 = vld [vmem:[#allocation5 + $0xd4] sm:$0xf0]  ;;  %v1167_v37 = vor.u32 %v1334_v34, %v1164_v35  ;;  %v111_v46 = vperm.slane %v109_v43, 0  ;;  %v1138_v57 = vld [vmem:[#allocation5 + $0x80] sm:$0xf]  ;;  %v112_v8 = vperm.slane %v109_v43, 1 }
  0x3e   :  { %v1179_v23 = vor.u32 %v1339_v21, %v1178_v20  ;;  %v1329_v58 = vld [vmem:[#allocation5 + $0x84] sm:$0xf0]  ;;  %v1350_v21 = vld [vmem:[%s1574_s5 + $0x30] sm:$0xff]  ;;  %v1347_v27 = vld [vmem:[%s1574_s5 + $0x18] sm:$0xff]  ;;  %vm860_vm0 = vcmask 48128  }
  0x3f   :  { %422 = vmatpush.bf16.msrb.mxu0 %v975_v15  ;;  %v1313_v15 = vld [vmem:[#allocation5 + $0x4] sm:$0xf0]  ;;  %v1139_v60 = vor.u32 %v1329_v58, %v1138_v57  ;;  %v1354_v26 = vld [vmem:[%s1574_s5 + $0x50] sm:$0xff] }
  0x40   :  { %435 = vmatpush.bf16.msrb.mxu1 %v1039_v16  ;;  %v1312_v16 = vld [vmem:[#allocation5 + $0x4] sm:$0xf]  ;;  %v1075_v17 = vor.u32 %v1313_v15, %v1074_v14  ;;  %v1357_v20 = vld [vmem:[%s1574_s5 + $0x68] sm:$0xff] }
  0x41   :  { %650 = vmatpush.bf16.msrb.mxu2 %v1099_v30  ;;  %v1079_v19 = vor.u32 %v1312_v16, %v1076_v18  ;;  %v1172_v30 = vld [vmem:[#allocation5 + $0xc8] sm:$0xf0]  ;;  %v1358_v18 = vld [vmem:[%s1574_s5 + $0x70] sm:$0xff] }
  0x43   :  { %423 = vmatpush.bf16.msrb.mxu0 %v967_v24  ;;  %v1180_v24 = vld [vmem:[#allocation5 + $0xd8] sm:$0xf0] }
  0x44   :  { %436 = vmatpush.bf16.msrb.mxu1 %v1031_v25  ;;  %v1183_v25 = vor.u32 %v1338_v22, %v1180_v24  ;;  %v1356_v22 = vld [vmem:[%s1574_s5 + $0x60] sm:$0xff]  ;;  %v1355_v24 = vld [vmem:[%s1574_s5 + $0x58] sm:$0xff] }
  0x45   :  { %651 = vmatpush.bf16.msrb.mxu2 %v1091_v59  ;;  %v1328_v59 = vld [vmem:[#allocation5 + $0x84] sm:$0xf] }
  0x47   :  { %424 = vmatpush.bf16.msrb.mxu0 %v959_v31  ;;  %v1175_v31 = vor.u32 %v1336_v29, %v1172_v30  ;;  %v1346_v29 = vld [vmem:[%s1574_s5 + $0x10] sm:$0xff]  ;;  %v1352_v30 = vld [vmem:[%s1574_s5 + $0x40] sm:$0xff] }
  0x48   :  { %437 = vmatpush.bf16.msrb.mxu1 %v1023_v32  ;;  %v1162_v32 = vld [vmem:[#allocation5 + $0xb0] sm:$0xf] }
  0x49   :  { %652 = vmatpush.bf16.msrb.mxu2 %v1083_v5  ;;  %v1163_v36 = vor.u32 %v1335_v33, %v1162_v32  ;;  %v1344_v33 = vld [vmem:[%s1574_s5] sm:$0xff] }
  0x4b   :  { %425 = vmatpush.bf16.msrb.mxu0 %v951_v39  ;;  %v1333_v39 = vld [vmem:[#allocation5 + $0xa4] sm:$0xf0] }
  0x4c   :  { %438 = vmatpush.bf16.msrb.mxu1 %v1015_v40  ;;  %v1332_v40 = vld [vmem:[#allocation5 + $0xa4] sm:$0xf]  ;;  %v1155_v42 = vor.u32 %v1333_v39, %v1154_v38 }
  0x4d   :  { %653 = vmatpush.bf16.msrb.mxu2 %v1075_v17 }
  0x4e   :  { %426 = vmatmul.bf16.vlgmr.msrb.gmra.mxu0 %v1501_v45  ;;  %v1194_v45 = vld [vmem:[#allocation5 + $0xf0] sm:$0xf] }
  0x4f   :  { %672 = vmatpush.bf16.msra.mxu0 %v1135_v41  ;;  %439 = vmatmul.bf16.vlgmr.msrb.gmra.mxu1 %v1503_v49  ;;  %v1342_v49 = vld [vmem:[#allocation5 + $0xf4] sm:$0xf]  ;;  %v1195_v63 = vor.u32 %v1343_v62, %v1194_v45  ;;  %v1156_v41 = vld [vmem:[#allocation5 + $0xa8] sm:$0xf0] }
  0x50   :  { %v1199_v1 = vor.u32 %v1342_v49, %v1196_v0  ;;  %v1359_v49 = vld [vmem:[%s1574_s5 + $0x78] sm:$0xff] }
  0x51   :  { %659 = vmatpush.bf16.msrb.mxu3 %v1195_v63 }
  0x52   :  { %685 = vmatpush.bf16.msra.mxu1 %v1199_v1 }
  0x53   :  { %673 = vmatpush.bf16.msra.mxu0 %v1127_v44  ;;  %v1159_v44 = vor.u32 %v1332_v40, %v1156_v41 }
  0x55   :  { %660 = vmatpush.bf16.msrb.mxu3 %v1187_v11 }
  0x56   :  { %686 = vmatpush.bf16.msra.mxu1 %v1191_v13 }
  0x57   :  { %674 = vmatpush.bf16.msra.mxu0 %v1119_v48  ;;  %v1331_v48 = vld [vmem:[#allocation5 + $0x94] sm:$0xf0] }
  0x58   :  { %v1147_v51 = vor.u32 %v1331_v48, %v1146_v47 }
  0x59   :  { %661 = vmatpush.bf16.msrb.mxu3 %v1179_v23  ;;  %v1349_v23 = vld [vmem:[%s1574_s5 + $0x28] sm:$0xff] }
  0x5a   :  { %687 = vmatpush.bf16.msra.mxu1 %v1183_v25  ;;  %v1348_v25 = vld [vmem:[%s1574_s5 + $0x20] sm:$0xff] }
  0x5b   :  { %675 = vmatpush.bf16.msra.mxu0 %v1111_v52  ;;  %v1148_v52 = vld [vmem:[#allocation5 + $0x98] sm:$0xf0] }
  0x5c   :  { %v1151_v53 = vor.u32 %v1330_v50, %v1148_v52 }
  0x5d   :  { %662 = vmatpush.bf16.msrb.mxu3 %v1171_v28  ;;  %v1353_v28 = vld [vmem:[%s1574_s5 + $0x48] sm:$0xff] }
  0x5e   :  { %688 = vmatpush.bf16.msra.mxu1 %v1175_v31  ;;  %v1345_v31 = vld [vmem:[%s1574_s5 + $0x8] sm:$0xff] }
  0x5f   :  { %676 = vmatpush.bf16.msra.mxu0 %v1103_v55 }
  0x61   :  { %663 = vmatpush.bf16.msrb.mxu3 %v1163_v36 }
  0x62   :  { %689 = vmatpush.bf16.msra.mxu1 %v1167_v37  ;;  %v480_v37 = vld [vmem:[%s1573_s4] sm:$0x3]  ;;  %s1448_s4 = smov [#allocation7]  }
  0x63   :  { %677 = vmatpush.bf16.msra.mxu0 %v1095_v61  ;;  %v1140_v61 = vld [vmem:[#allocation5 + $0x88] sm:$0xf0]  ;;  %v483_v38 = vperm.slane %v480_v37, 1  ;;  %v482_v41 = vperm.slane %v480_v37, 0  ;;  %s867_s23 = sshll.u32 %s1448_s4, 4  ;;  %s868_s23 = int_to_ptr.vmem [resolvable:$true] %s867_s23 }
  0x64   :  { %v1143_v45 = vor.u32 %v1328_v59, %v1140_v61 }
  0x65   :  { %664 = vmatpush.bf16.msrb.mxu3 %v1155_v42 }
  0x66   :  { %690 = vmatpush.bf16.msra.mxu1 %v1159_v44 }
  0x67   :  { %678 = vmatpush.bf16.msra.mxu0 %v1087_v7 }
  0x69   :  { %665 = vmatpush.bf16.msrb.mxu3 %v1147_v51 }
  0x6a   :  { %691 = vmatpush.bf16.msra.mxu1 %v1151_v53 }
  0x6b   :  { %679 = vmatpush.bf16.msra.mxu0 %v1079_v19  ;;  %v1351_v19 = vld [vmem:[%s1574_s5 + $0x38] sm:$0xff] }
  0x6c   :  { %834 = vmatpush.bf16.msra.mxu2 %v1351_v19 }
  0x6d   :  { %666 = vmatpush.bf16.msrb.mxu3 %v1139_v60 }
  0x6e   :  { %692 = vmatpush.bf16.msra.mxu1 %v1143_v45 }
  0x70   :  { %835 = vmatpush.bf16.msra.mxu2 %v1350_v21 }
  0x71   :  { %847 = vmatpush.bf16.msra.mxu3 %v1359_v49 }
  0x74   :  { %836 = vmatpush.bf16.msra.mxu2 %v1349_v23 }
  0x75   :  { %848 = vmatpush.bf16.msra.mxu3 %v1358_v18 }
  0x78   :  { %837 = vmatpush.bf16.msra.mxu2 %v1348_v25 }
  0x79   :  { %849 = vmatpush.bf16.msra.mxu3 %v1357_v20 }
  0x7c   :  { %838 = vmatpush.bf16.msra.mxu2 %v1347_v27 }
  0x7d   :  { %850 = vmatpush.bf16.msra.mxu3 %v1356_v22 }
  0x80   :  { %839 = vmatpush.bf16.msra.mxu2 %v1346_v29 }
  0x81   :  { %851 = vmatpush.bf16.msra.mxu3 %v1355_v24 }
  0x84   :  { %840 = vmatpush.bf16.msra.mxu2 %v1345_v31 }
  0x85   :  { %852 = vmatpush.bf16.msra.mxu3 %v1354_v26 }
  0x88   :  { %841 = vmatpush.bf16.msra.mxu2 %v1344_v33 }
  0x89   :  { %853 = vmatpush.bf16.msra.mxu3 %v1353_v28 }
  0x8d   :  { %854 = vmatpush.bf16.msra.mxu3 %v1352_v30 }
  0xab   :  { %v375_v54 = vpop.f32.mrf.mxu0 }
  0xac   :  { %v376_v55 = vadd.f32 %v375_v54, %v111_v46  ;;  %v388_v56 = vpop.f32.mrf.mxu1 }
  0xae   :  { %v389_v62 = vadd.f32 %v388_v56, %v376_v55  ;;  %v1365_v55 = vld [vmem:[%s1575_s6] ss:$0 sm:$0xff] }
  0xb3   :  { %v401_v63 = vpop.f32.mrf.mxu2  ;;  %v377_v0 = vpop.f32.mrf.mxu0 }
  0xb4   :  { %v402_v1 = vadd.f32 %v401_v63, %v389_v62  ;;  %v390_v2 = vpop.f32.mrf.mxu1 }
  0xb6   :  { %v444_v3 = vmax.f32 %v402_v1, 0.0 }
  0xb7   :  { %v414_v5 = vpop.f32.mrf.mxu3 }
  0xb8   :  { %v446_v4 = vpack.c.bf16 %v444_v3, %v444_v3  ;;  %v415_v9 = vadd.f32 %v414_v5, %v112_v8 }
  0xba   :  { %654 = vmatmul.bf16.vlgmr.msrb.gmra.mxu2 %v446_v4  ;;  %680 = vmatmul.bf16.vlgmr.msra.gmra.mxu0 %v446_v4 }
  0xbb   :  { %v403_v6 = vpop.f32.mrf.mxu2 }
  0xbf   :  { %v416_v7 = vpop.f32.mrf.mxu3 }
  0xcb   :  { %v427_v10 = vpop.f32.mrf.mxu0 }
  0xcc   :  { %v428_v11 = vadd.f32 %v427_v10, %v415_v9  ;;  %v440_v12 = vpop.f32.mrf.mxu1 }
  0xce   :  { %v441_v13 = vadd.f32 %v440_v12, %v428_v11 }
  0xd0   :  { %v445_v14 = vmax.f32 %v441_v13, 0.0 }
  0xd2   :  { %v447_v15 = vpack.c.bf16 %v445_v14, %v445_v14 }
  0xd3   :  { %v429_v16 = vpop.f32.mrf.mxu0 }
  0xd4   :  { %v442_v17 = vpop.f32.mrf.mxu1  ;;  %667 = vmatmul.bf16.vlgmr.msrb.gmra.mxu3 %v447_v15  ;;  %693 = vmatmul.bf16.vlgmr.msra.gmra.mxu1 %v447_v15 }
 0x137   :  { %v681_v32 = vpop.f32.mrf.mxu0 }
 0x138   :  { %v682_v39 = vadd.f32 %v681_v32, %v483_v38 }
 0x13d   :  { %v655_v34 = vpop.f32.mrf.mxu2 }
 0x13e   :  { %v656_v44 = vadd.f32 %v655_v34, %v482_v41 }
 0x13f   :  { %v683_v35 = vpop.f32.mrf.mxu0 }
 0x145   :  { %v657_v36 = vpop.f32.mrf.mxu2 }
 0x151   :  { %v694_v40 = vpop.f32.mrf.mxu1 }
 0x152   :  { %v695_v42 = vadd.f32 %v694_v40, %v682_v39 }
 0x154   :  { %v699_v43 = vmax.f32 %v695_v42, 0.0 }
 0x156   :  { %v701_v46 = vpack.c.bf16 %v699_v43, %v699_v43 }
 0x157   :  { %v668_v47 = vpop.f32.mrf.mxu3 }
 0x158   :  { %v669_v48 = vadd.f32 %v668_v47, %v656_v44  ;;  %855 = vmatmul.bf16.vlgmr.msra.gmra.mxu3 %v701_v46 }
 0x159   :  { %v696_v50 = vpop.f32.mrf.mxu1 }
 0x15a   :  { %v698_v51 = vmax.f32 %v669_v48, 0.0 }
 0x15c   :  { %v700_v52 = vpack.c.bf16 %v698_v51, %v698_v51 }
 0x15e   :  { %842 = vmatmul.bf16.vlgmr.msra.gmra.mxu2 %v700_v52 }
 0x15f   :  { %v670_v53 = vpop.f32.mrf.mxu3 }
 0x1db   :  { %v856_v54 = vpop.f32.mrf.mxu3 }
 0x1e1   :  { %v843_v56 = vpop.f32.mrf.mxu2 }
 0x1e2   :  { %v844_v57 = vadd.f32 %v1365_v55, %v843_v56 }
 0x1e3   :  { %v858_v58 = vpop.f32.mrf.mxu3 }
 0x1e4   :  { %v857_v59 = vadd.f32 %v856_v54, %v844_v57 }
 0x1e6   :  { %861 = vst.msk [vmem:[#allocation7] sm:$0xff] %vm860_vm0, %v857_v59 }
 0x1e7   :  { %872 = dma.vmem_to_hbm [thread:$0]  %s868_s23, 128, %s870_s26, [#allocation4]  }
 0x1e9   :  { %v845_v60 = vpop.f32.mrf.mxu2 }
 0x1ea   :  { %1442 = dma.done.wait [#allocation4], 128  }
 0x1eb   :  { %1443 = vsyncadd [#allocation4], 4294967168 }
 0x1ec   :  { %877 = vsyncpa [#allocation3], 1 }
 0x1ed   :  { %878 = vsyncpa [#allocation6], 1 }
 0x1ee   :  { %879 = vsyncpa [#allocation4], 1 }

</bundles_post_ra>
